<compile_context>
chip_gen: v5e
topology: v5e:2x2
jax: 0.10.0
libtpu: 0.0.40
codegen_flags: <defaults>
</compile_context>

<pallas_src>
import functools

import jax
import jax.numpy as jnp
from jax.experimental import pallas as pl
from jax.experimental.pallas import tpu as pltpu

_LANE = 128
_MIB = 1024 * 1024
_VMEM_BUDGET = 44 * _MIB      # block-footprint target (headroom under v7x's 64 MiB)
_VMEM_LIMIT_CAP = 56 * _MIB   # never ask Mosaic for more than this (v7x-safe)
_RESIDENT_X_CAP = 8 * _MIB    # keep X/T fully VMEM-resident if its bf16 bytes <= this
_PAD_WASTE_LIMIT = 1.15       # max tolerated node-padding blow-up from tile rounding
_TILE_CANDIDATES = (2048, 1024, 512, 256, 128)


def _round_up(x, m):
    return ((x + m - 1) // m) * m


# --------------------------------------------------------------------------- #
# Kernels
# --------------------------------------------------------------------------- #
def _transform_kernel(x_ref, w_ref, o_ref):
    """T = X @ W  (bf16 x bf16 -> f32 on the MXU, stored back as bf16)."""
    o_ref[...] = jnp.dot(
        x_ref[...], w_ref[...], preferred_element_type=jnp.float32
    ).astype(o_ref.dtype)


def _aggregate_kernel(a_ref, t_ref, b_ref, o_ref, acc_ref, *,
                      apply_relu, x_resident, tk):
    """out = act(A_hat @ T + b); grid axis 1 is the A-column reduction."""
    k = pl.program_id(1)

    @pl.when(k == 0)
    def _():
        acc_ref[...] = jnp.zeros_like(acc_ref)

    if x_resident:
        row0 = pl.multiple_of(k * tk, tk)
        t_blk = t_ref[pl.ds(row0, tk), :]
    else:
        t_blk = t_ref[...]
    acc_ref[...] += jnp.dot(a_ref[...], t_blk, preferred_element_type=jnp.float32)

    @pl.when(k == pl.num_programs(1) - 1)
    def _():
        y = acc_ref[...] + b_ref[...]
        if apply_relu:
            y = jnp.maximum(y, 0.0)
        o_ref[...] = y.astype(o_ref.dtype)


def _aggregate_transform_kernel(a_ref, x_ref, w_ref, b_ref, o_ref, acc_ref, *,
                                apply_relu, x_resident, tk):
    """out = act((A_hat @ X) @ W + b); used when input width < output width."""
    k = pl.program_id(1)

    @pl.when(k == 0)
    def _():
        acc_ref[...] = jnp.zeros_like(acc_ref)

    if x_resident:
        row0 = pl.multiple_of(k * tk, tk)
        x_blk = x_ref[pl.ds(row0, tk), :]
    else:
        x_blk = x_ref[...]
    acc_ref[...] += jnp.dot(a_ref[...], x_blk, preferred_element_type=jnp.float32)

    @pl.when(k == pl.num_programs(1) - 1)
    def _():
        # bf16 finalize matmul: f32 x f32 on the MXU is multi-pass emulation.
        y = jnp.dot(acc_ref[...].astype(jnp.bfloat16), w_ref[...],
                    preferred_element_type=jnp.float32) + b_ref[...]
        if apply_relu:
            y = jnp.maximum(y, 0.0)
        o_ref[...] = y.astype(o_ref.dtype)


# --------------------------------------------------------------------------- #
# VMEM budgeting / tile selection
# --------------------------------------------------------------------------- #
def _agg_vmem_need(tm, tk, n_pad, w_agg, w_out, out_itemsize, x_resident,
                   weight_shape=None):
    need = 2 * tm * tk * 2                                  # A tile, dbl-buffered bf16
    need += 2 * (n_pad if x_resident else tk) * w_agg * 2   # X / T operand (bf16)
    need += tm * w_agg * 4                                  # f32 accumulator scratch
    need += 2 * tm * w_out * out_itemsize                   # output tile, dbl-buffered
    need += 2 * w_out * 4                                   # bias
    if weight_shape is not None:
        need += 2 * weight_shape[0] * weight_shape[1] * 2   # resident bf16 weight
    return need


def _vmem_limit(need):
    return int(min(_VMEM_LIMIT_CAP, max(32 * _MIB, need + 8 * _MIB)))


def _select_tiling(n, layer_cfgs):
    """Pick (tile, n_pad): largest tile whose per-layer worst-case VMEM block
    footprint fits the budget, bounded padding waste, and (preferably) an even
    number of row tiles so the parallel axis balances v7x's two TensorCores."""
    n128 = _round_up(max(n, 1), _LANE)

    def worst_need(t, n_pad):
        worst = 0
        for cfg in layer_cfgs:
            resident = n_pad * cfg["w_agg"] * 2 <= _RESIDENT_X_CAP
            nd = _agg_vmem_need(t, t, n_pad, cfg["w_agg"], cfg["w_out"],
                                cfg["out_itemsize"], resident, cfg["weight_shape"])
            worst = max(worst, nd)
        return worst

    fitting = []
    for t in _TILE_CANDIDATES:
        if t > n128:
            continue
        n_pad = _round_up(n128, t)
        if n_pad > _PAD_WASTE_LIMIT * n128:
            continue
        if worst_need(t, n_pad) > _VMEM_BUDGET:
            continue
        fitting.append((t, n_pad))
    if not fitting:
        return _LANE, _round_up(n128, _LANE)
    for t, n_pad in fitting:                 # descending tile order
        n_tiles = n_pad // t
        if n_tiles == 1 or n_tiles % 2 == 0:
            return t, n_pad
    return fitting[0]


def _select_transform_tile(n_pad, agg_tile, f_pad, h_pad):
    for t in _TILE_CANDIDATES:
        if t > agg_tile or (n_pad % t) != 0:
            continue
        need = 2 * t * f_pad * 2 + 2 * f_pad * h_pad * 2 + 2 * t * h_pad * 2
        if need <= _VMEM_BUDGET:
            return t
    return _LANE


# --------------------------------------------------------------------------- #
# pallas_call wrappers
# --------------------------------------------------------------------------- #
def transform_nodes(x_bf, w_bf, *, tile):
    """T = X @ W: row-tiled dense matmul (bf16 in/out, f32 MXU accumulation)."""
    n_pad, f_pad = x_bf.shape
    h_pad = w_bf.shape[1]
    need = 2 * tile * f_pad * 2 + 2 * f_pad * h_pad * 2 + 2 * tile * h_pad * 2
    return pl.pallas_call(
        _transform_kernel,
        out_shape=jax.ShapeDtypeStruct((n_pad, h_pad), jnp.bfloat16),
        grid_spec=pltpu.PrefetchScalarGridSpec(
            num_scalar_prefetch=0,
            grid=(n_pad // tile,),
            in_specs=[
                pl.BlockSpec((tile, f_pad), lambda i: (i, 0)),
                pl.BlockSpec((f_pad, h_pad), lambda i: (0, 0)),
            ],
            out_specs=pl.BlockSpec((tile, h_pad), lambda i: (i, 0)),
        ),
        compiler_params=pltpu.CompilerParams(
            dimension_semantics=("parallel",),
            vmem_limit_bytes=_vmem_limit(need),
        ),
        cost_estimate=pl.CostEstimate(
            flops=2 * n_pad * f_pad * h_pad,
            transcendentals=0,
            bytes_accessed=x_bf.size * 2 + w_bf.size * 2 + n_pad * h_pad * 2,
        ),
    )(x_bf, w_bf)


def aggregate_nodes(a_bf, t_bf, b, *, apply_relu, out_dtype, tile, x_resident):
    """out = act(A_hat @ T + b), tiled over (row tiles, A-column reduction tiles)."""
    n_pad = a_bf.shape[0]
    w_agg = t_bf.shape[1]
    tm = tk = tile
    grid = (n_pad // tm, n_pad // tk)
    out_itemsize = jnp.dtype(out_dtype).itemsize
    need = _agg_vmem_need(tm, tk, n_pad, w_agg, w_agg, out_itemsize, x_resident)

    if x_resident:
        t_spec = pl.BlockSpec((n_pad, w_agg), lambda i, k: (0, 0))   # fetched once
    else:
        t_spec = pl.BlockSpec((tk, w_agg), lambda i, k: (k, 0))      # streamed per k

    bytes_accessed = (
        a_bf.size * 2
        + (t_bf.size * 2 if x_resident else (n_pad // tm) * t_bf.size * 2)
        + b.size * 4
        + n_pad * w_agg * out_itemsize
    )
    return pl.pallas_call(
        functools.partial(_aggregate_kernel, apply_relu=apply_relu,
                          x_resident=x_resident, tk=tk),
        out_shape=jax.ShapeDtypeStruct((n_pad, w_agg), out_dtype),
        grid_spec=pltpu.PrefetchScalarGridSpec(
            num_scalar_prefetch=0,
            grid=grid,
            in_specs=[
                pl.BlockSpec((tm, tk), lambda i, k: (i, k)),     # A_hat tile (streamed)
                t_spec,                                          # T operand
                pl.BlockSpec((1, w_agg), lambda i, k: (0, 0)),   # bias
            ],
            out_specs=pl.BlockSpec((tm, w_agg), lambda i, k: (i, 0)),
            scratch_shapes=[pltpu.VMEM((tm, w_agg), jnp.float32)],
        ),
        compiler_params=pltpu.CompilerParams(
            dimension_semantics=("parallel", "arbitrary"),
            vmem_limit_bytes=_vmem_limit(need),
        ),
        cost_estimate=pl.CostEstimate(
            flops=2 * n_pad * n_pad * w_agg, transcendentals=0,
            bytes_accessed=bytes_accessed,
        ),
    )(a_bf, t_bf, b)


def aggregate_transform_nodes(a_bf, x_bf, w_bf, b, *, apply_relu, out_dtype, tile,
                              x_resident):
    """out = act((A_hat @ X) @ W + b) — aggregate-first ordering."""
    n_pad = a_bf.shape[0]
    f_pad = x_bf.shape[1]
    h_pad = w_bf.shape[1]
    tm = tk = tile
    grid = (n_pad // tm, n_pad // tk)
    out_itemsize = jnp.dtype(out_dtype).itemsize
    need = _agg_vmem_need(tm, tk, n_pad, f_pad, h_pad, out_itemsize, x_resident,
                          weight_shape=(f_pad, h_pad))

    if x_resident:
        x_spec = pl.BlockSpec((n_pad, f_pad), lambda i, k: (0, 0))
    else:
        x_spec = pl.BlockSpec((tk, f_pad), lambda i, k: (k, 0))

    bytes_accessed = (
        a_bf.size * 2
        + (x_bf.size * 2 if x_resident else (n_pad // tm) * x_bf.size * 2)
        + w_bf.size * 2 + b.size * 4
        + n_pad * h_pad * out_itemsize
    )
    return pl.pallas_call(
        functools.partial(_aggregate_transform_kernel, apply_relu=apply_relu,
                          x_resident=x_resident, tk=tk),
        out_shape=jax.ShapeDtypeStruct((n_pad, h_pad), out_dtype),
        grid_spec=pltpu.PrefetchScalarGridSpec(
            num_scalar_prefetch=0,
            grid=grid,
            in_specs=[
                pl.BlockSpec((tm, tk), lambda i, k: (i, k)),      # A_hat tile
                x_spec,                                           # X operand
                pl.BlockSpec((f_pad, h_pad), lambda i, k: (0, 0)),  # weight (bf16)
                pl.BlockSpec((1, h_pad), lambda i, k: (0, 0)),      # bias
            ],
            out_specs=pl.BlockSpec((tm, h_pad), lambda i, k: (i, 0)),
            scratch_shapes=[pltpu.VMEM((tm, f_pad), jnp.float32)],
        ),
        compiler_params=pltpu.CompilerParams(
            dimension_semantics=("parallel", "arbitrary"),
            vmem_limit_bytes=_vmem_limit(need),
        ),
        cost_estimate=pl.CostEstimate(
            flops=2 * n_pad * n_pad * f_pad + 2 * n_pad * f_pad * h_pad,
            transcendentals=0, bytes_accessed=bytes_accessed,
        ),
    )(a_bf, x_bf, w_bf, b)


# --------------------------------------------------------------------------- #
# Wrapper-side glue
# --------------------------------------------------------------------------- #
def build_normalized_adjacency_padded(edge_index, num_nodes, n_pad,
                                      dtype=jnp.bfloat16):
    """A_hat = D^{-1/2}(A + I)D^{-1/2} written directly into the (n_pad, n_pad)
    lane-padded buffer; padded rows/columns stay exactly zero."""
    # TODO(synk): PyG's gcn_norm sums duplicate edges after add_self_loops; this
    #             matches the original script's (A.set(1) + I) construction.
    src, dst = edge_index[0], edge_index[1]
    a = jnp.zeros((n_pad, n_pad), jnp.float32)
    a = a.at[src, dst].set(1.0)
    a = a.at[dst, src].set(1.0)                 # undirected
    diag = jnp.arange(num_nodes)
    a = a.at[diag, diag].add(1.0)               # self loops (real nodes only)
    deg = jnp.sum(a, axis=1)
    d_inv_sqrt = jnp.where(deg > 0, jax.lax.rsqrt(deg), 0.0)
    return (d_inv_sqrt[:, None] * a * d_inv_sqrt[None, :]).astype(dtype)


def init_params(key, feature_num, first_layer_dimension, output_num):
    """Deterministic Glorot-uniform init (PyG GCNConv reset_parameters style)."""
    k1, k2 = jax.random.split(key)

    def glorot(k, fan_in, fan_out):
        limit = jnp.sqrt(6.0 / (fan_in + fan_out))
        return jax.random.uniform(k, (fan_in, fan_out), jnp.float32, -limit, limit)

    w1 = glorot(k1, feature_num, first_layer_dimension)
    b1 = jnp.zeros((1, first_layer_dimension), jnp.float32)
    w2 = glorot(k2, first_layer_dimension, output_num)
    b2 = jnp.zeros((1, output_num), jnp.float32)
    return w1, b1, w2, b2


def model_forward(x, edge_index, params, drop_rate=0.0, *,
                  prefer_transform_first=True, allow_resident_operand=True):
    # drop_rate == 0 -> the dropping method is the identity (see TODO above).
    del drop_rate
    w1, b1, w2, b2 = params
    n, f_in = x.shape
    h_dim = w1.shape[1]
    out_dim = w2.shape[1]

    f_pad = _round_up(f_in, _LANE)
    h_pad = _round_up(h_dim, _LANE)
    o_pad = _round_up(out_dim, _LANE)

    # Per-layer ordering: transform-first keeps the aggregation operand/acc at
    # the output width, aggregate-first at the input width; pick the narrower.
    l1_tf = prefer_transform_first and h_pad <= f_pad
    l2_tf = prefer_transform_first and o_pad <= h_pad

    layer_cfgs = [
        dict(w_agg=h_pad if l1_tf else f_pad, w_out=h_pad, out_itemsize=2,
             weight_shape=None if l1_tf else (f_pad, h_pad)),
        dict(w_agg=o_pad if l2_tf else h_pad, w_out=o_pad, out_itemsize=4,
             weight_shape=None if l2_tf else (h_pad, o_pad)),
    ]
    tile, n_pad = _select_tiling(n, layer_cfgs)

    def resident(width):
        return allow_resident_operand and (n_pad * width * 2 <= _RESIDENT_X_CAP)

    # Build the padded bf16 operands directly (single pass, no separate pad copy).
    a_bf = build_normalized_adjacency_padded(edge_index, n, n_pad)
    x_bf = jnp.zeros((n_pad, f_pad), jnp.bfloat16).at[:n, :f_in].set(
        x.astype(jnp.bfloat16))
    w1_bf = jnp.zeros((f_pad, h_pad), jnp.bfloat16).at[:f_in, :h_dim].set(
        w1.astype(jnp.bfloat16))
    b1_p = jnp.zeros((1, h_pad), jnp.float32).at[:, :h_dim].set(b1)
    w2_bf = jnp.zeros((h_pad, o_pad), jnp.bfloat16).at[:h_dim, :out_dim].set(
        w2.astype(jnp.bfloat16))
    b2_p = jnp.zeros((1, o_pad), jnp.float32).at[:, :out_dim].set(b2)

    # Layer 1: h = relu(A_hat @ X @ W1 + b1).
    if l1_tf:
        t1 = transform_nodes(x_bf, w1_bf,
                             tile=_select_transform_tile(n_pad, tile, f_pad, h_pad))
        h = aggregate_nodes(a_bf, t1, b1_p, apply_relu=True, out_dtype=jnp.bfloat16,
                            tile=tile, x_resident=resident(h_pad))
    else:
        h = aggregate_transform_nodes(a_bf, x_bf, w1_bf, b1_p, apply_relu=True,
                                      out_dtype=jnp.bfloat16, tile=tile,
                                      x_resident=resident(f_pad))

    # Layer 2: out = A_hat @ h @ W2 + b2 (no activation).
    if l2_tf:
        t2 = transform_nodes(h, w2_bf,
                             tile=_select_transform_tile(n_pad, tile, h_pad, o_pad))
        out_p = aggregate_nodes(a_bf, t2, b2_p, apply_relu=False,
                                out_dtype=jnp.float32, tile=tile,
                                x_resident=resident(o_pad))
    else:
        out_p = aggregate_transform_nodes(a_bf, h, w2_bf, b2_p, apply_relu=False,
                                          out_dtype=jnp.float32, tile=tile,
                                          x_resident=resident(h_pad))

    return out_p[:n, :out_dim]


def reference_forward(x, edge_index, params):
    """Pure-JAX reference of the same math, mimicking the kernel's bf16 streams."""
    w1, b1, w2, b2 = params
    n = x.shape[0]
    a = build_normalized_adjacency_padded(edge_index, n, n, dtype=jnp.float32)
    a = a.astype(jnp.bfloat16).astype(jnp.float32)
    xb = x.astype(jnp.bfloat16).astype(jnp.float32)
    w1b = w1.astype(jnp.bfloat16).astype(jnp.float32)
    w2b = w2.astype(jnp.bfloat16).astype(jnp.float32)
    h = jnp.maximum(a @ (xb @ w1b) + b1, 0.0)
    h = h.astype(jnp.bfloat16).astype(jnp.float32)
    return a @ (h @ w2b) + b2


if __name__ == "__main__":
    key = jax.random.PRNGKey(0)

    def make_graph(k, n, f_in, n_extra_edges):
        kx, ke = jax.random.split(k)
        xg = jax.random.normal(kx, (n, f_in), jnp.float32)
        ring_src = jnp.arange(n, dtype=jnp.int32)
        ring_dst = (ring_src + 1) % n
        rand_src = jax.random.randint(ke, (n_extra_edges,), 0, n, dtype=jnp.int32)
        rand_dst = (rand_src + 3) % n
        edge_index = jnp.stack([
            jnp.concatenate([ring_src, rand_src]),
            jnp.concatenate([ring_dst, rand_dst]),
        ])
        return xg, edge_index

    fwd = jax.jit(model_forward,
                  static_argnames=("prefer_transform_first",
                                   "allow_resident_operand"))

    ok = True

    # Case 1: tiny graph (single 128x128 tile; transform-first, resident operand).
    k1, k2, kp1, kp2 = jax.random.split(key, 4)
    N1, F1, H1, O1 = 16, 8, 32, 4
    x1, ei1 = make_graph(k1, N1, F1, 8)
    p1 = init_params(kp1, F1, H1, O1)
    out1 = jax.block_until_ready(fwd(x1, ei1, p1))
    ref1 = reference_forward(x1, ei1, p1)
    ok &= out1.shape == (N1, O1)
    ok &= bool(jnp.allclose(out1, ref1, atol=5e-2, rtol=5e-2))

    # Case 2: medium graph (3 reduction tiles). Run the default path
    # (transform-first + VMEM-resident operand) and the forced aggregate-first /
    # streamed-operand path so both kernel variants are exercised.
    N2, F2, H2, O2 = 384, 20, 64, 7
    x2, ei2 = make_graph(k2, N2, F2, 64)
    p2 = init_params(kp2, F2, H2, O2)
    ref2 = reference_forward(x2, ei2, p2)

    out2a = jax.block_until_ready(fwd(x2, ei2, p2))
    ok &= out2a.shape == (N2, O2)
    ok &= bool(jnp.allclose(out2a, ref2, atol=5e-2, rtol=5e-2))

    out2b = jax.block_until_ready(
        fwd(x2, ei2, p2, prefer_transform_first=False,
            allow_resident_operand=False))
    ok &= bool(jnp.allclose(out2b, ref2, atol=5e-2, rtol=5e-2))

    assert ok, "mismatch vs pure-JAX reference"
    print("KERNEL_OK")
</pallas_src>

<mosaic_0001>
module attributes {stable_mosaic.version = 11 : i64} {
  func.func @_transform_kernel(%arg0: i32, %arg1: memref<128x128xbf16, #tpu.memory_space<vmem>>, %arg2: memref<128x128xbf16, #tpu.memory_space<vmem>>, %arg3: memref<128x128xbf16, #tpu.memory_space<vmem>>) attributes {dimension_semantics = [#tpu.dimension_semantics<parallel>], iteration_bounds = array<i64: 1>, scalar_prefetch = 0 : i64, scratch_operands = 0 : i64, tpu.core_type = #tpu.core_type<tc>, window_params = [{transform_indices = @transform_0, window_bounds = array<i64: 128, 128>}, {pipeline_mode = #tpu.pipeline_mode<synchronous>, transform_indices = @transform_1, window_bounds = array<i64: 128, 128>}, {transform_indices = @transform_2, window_bounds = array<i64: 128, 128>}]} {
    %c0 = arith.constant 0 : index
    %c0_0 = arith.constant 0 : index
    %0 = vector.load %arg1[%c0, %c0_0] : memref<128x128xbf16, #tpu.memory_space<vmem>>, vector<128x128xbf16>
    %c0_1 = arith.constant 0 : index
    %c0_2 = arith.constant 0 : index
    %1 = vector.load %arg2[%c0_1, %c0_2] : memref<128x128xbf16, #tpu.memory_space<vmem>>, vector<128x128xbf16>
    %cst = arith.constant dense<0.000000e+00> : vector<128x128xf32>
    %2 = tpu.matmul %0, %1, %cst {dimension_numbers = #tpu.dot_dimension_numbers<[1], [0], [0], [1], [0, 0, 1, 1], [], []>} : vector<128x128xbf16>, vector<128x128xbf16>, vector<128x128xf32> -> vector<128x128xf32>
    %3 = arith.truncf %2 : vector<128x128xf32> to vector<128x128xbf16>
    %c0_3 = arith.constant 0 : index
    %c0_4 = arith.constant 0 : index
    %4 = vector.load %arg3[%c0_3, %c0_4] : memref<128x128xbf16, #tpu.memory_space<vmem>>, vector<128x128xbf16>
    tpu.vector_store %arg3[%c0_3, %c0_4], %3 {strides = array<i32>} : memref<128x128xbf16, #tpu.memory_space<vmem>>, vector<128x128xbf16>,
    return
  }
  func.func @transform_0(%arg0: i32) -> (i32, i32) {
    %c0_i32 = arith.constant 0 : i32
    %c0_i32_0 = arith.constant 0 : i32
    return %arg0, %c0_i32 : i32, i32
  }
  func.func @transform_1(%arg0: i32) -> (i32, i32) {
    %c0_i32 = arith.constant 0 : i32
    %c0_i32_0 = arith.constant 0 : i32
    %c0_i32_1 = arith.constant 0 : i32
    return %c0_i32, %c0_i32_0 : i32, i32
  }
  func.func @transform_2(%arg0: i32) -> (i32, i32) {
    %c0_i32 = arith.constant 0 : i32
    %c0_i32_0 = arith.constant 0 : i32
    return %arg0, %c0_i32 : i32, i32
  }
}

module attributes {stable_mosaic.version = 11 : i64} {
  func.func @_aggregate_kernel(%arg0: i32, %arg1: i32, %arg2: memref<128x128xbf16, #tpu.memory_space<vmem>>, %arg3: memref<128x128xbf16, #tpu.memory_space<vmem>>, %arg4: memref<1x128xf32, #tpu.memory_space<vmem>>, %arg5: memref<128x128xbf16, #tpu.memory_space<vmem>>, %arg6: memref<128x128xf32, #tpu.memory_space<vmem>>) attributes {dimension_semantics = [#tpu.dimension_semantics<parallel>, #tpu.dimension_semantics<arbitrary>], iteration_bounds = array<i64: 1, 1>, scalar_prefetch = 0 : i64, scratch_operands = 1 : i64, tpu.core_type = #tpu.core_type<tc>, window_params = [{transform_indices = @transform_0, window_bounds = array<i64: 128, 128>}, {pipeline_mode = #tpu.pipeline_mode<synchronous>, transform_indices = @transform_1, window_bounds = array<i64: 128, 128>}, {pipeline_mode = #tpu.pipeline_mode<synchronous>, transform_indices = @transform_2, window_bounds = array<i64: 1, 128>}, {transform_indices = @transform_3, window_bounds = array<i64: 128, 128>}]} {
    %c0_i32 = arith.constant 0 : i32
    %0 = arith.cmpi eq, %arg1, %c0_i32 : i32
    %1 = arith.extui %0 : i1 to i32
    %c0_i32_0 = arith.constant 0 : i32
    %2 = arith.cmpi ne, %1, %c0_i32_0 : i32
    scf.if %2 {
      %cst_9 = arith.constant 0.000000e+00 : f32
      %15 = vector.broadcast %cst_9 : f32 to vector<128x128xf32>
      %c0_10 = arith.constant 0 : index
      %c0_11 = arith.constant 0 : index
      %16 = vector.load %arg6[%c0_10, %c0_11] : memref<128x128xf32, #tpu.memory_space<vmem>>, vector<128x128xf32>
      tpu.vector_store %arg6[%c0_10, %c0_11], %15 {strides = array<i32>} : memref<128x128xf32, #tpu.memory_space<vmem>>, vector<128x128xf32>,
    } else {
    }
    %c128_i32 = arith.constant 128 : i32
    %3 = arith.muli %arg1, %c128_i32 : i32
    %4 = tpu.assume_multiple %3, 128 : i32
    %5 = arith.index_cast %4 : i32 to index
    %c0 = arith.constant 0 : index
    %6 = vector.load %arg3[%5, %c0] : memref<128x128xbf16, #tpu.memory_space<vmem>>, vector<128x128xbf16>
    %c0_1 = arith.constant 0 : index
    %c0_2 = arith.constant 0 : index
    %7 = vector.load %arg6[%c0_1, %c0_2] : memref<128x128xf32, #tpu.memory_space<vmem>>, vector<128x128xf32>
    %c0_3 = arith.constant 0 : index
    %c0_4 = arith.constant 0 : index
    %8 = vector.load %arg2[%c0_3, %c0_4] : memref<128x128xbf16, #tpu.memory_space<vmem>>, vector<128x128xbf16>
    %cst = arith.constant dense<0.000000e+00> : vector<128x128xf32>
    %9 = tpu.matmul %8, %6, %cst {dimension_numbers = #tpu.dot_dimension_numbers<[1], [0], [0], [1], [0, 0, 1, 1], [], []>} : vector<128x128xbf16>, vector<128x128xbf16>, vector<128x128xf32> -> vector<128x128xf32>
    %10 = arith.addf %7, %9 : vector<128x128xf32>
    %c0_5 = arith.constant 0 : index
    %c0_6 = arith.constant 0 : index
    %11 = vector.load %arg6[%c0_5, %c0_6] : memref<128x128xf32, #tpu.memory_space<vmem>>, vector<128x128xf32>
    tpu.vector_store %arg6[%c0_5, %c0_6], %10 {strides = array<i32>} : memref<128x128xf32, #tpu.memory_space<vmem>>, vector<128x128xf32>,
    %c0_i32_7 = arith.constant 0 : i32
    %12 = arith.cmpi eq, %arg1, %c0_i32_7 : i32
    %13 = arith.extui %12 : i1 to i32
    %c0_i32_8 = arith.constant 0 : i32
    %14 = arith.cmpi ne, %13, %c0_i32_8 : i32
    scf.if %14 {
      %c0_9 = arith.constant 0 : index
      %c0_10 = arith.constant 0 : index
      %15 = vector.load %arg6[%c0_9, %c0_10] : memref<128x128xf32, #tpu.memory_space<vmem>>, vector<128x128xf32>
      %c0_11 = arith.constant 0 : index
      %c0_12 = arith.constant 0 : index
      %16 = vector.load %arg4[%c0_11, %c0_12] : memref<1x128xf32, #tpu.memory_space<vmem>>, vector<1x128xf32>
      %17 = vector.broadcast %16 : vector<1x128xf32> to vector<128x128xf32>
      %18 = arith.addf %15, %17 : vector<128x128xf32>
      %cst_13 = arith.constant 0.000000e+00 : f32
      %19 = vector.broadcast %cst_13 : f32 to vector<128x128xf32>
      %20 = arith.maximumf %18, %19 : vector<128x128xf32>
      %21 = arith.truncf %20 : vector<128x128xf32> to vector<128x128xbf16>
      %c0_14 = arith.constant 0 : index
      %c0_15 = arith.constant 0 : index
      %22 = vector.load %arg5[%c0_14, %c0_15] : memref<128x128xbf16, #tpu.memory_space<vmem>>, vector<128x128xbf16>
      tpu.vector_store %arg5[%c0_14, %c0_15], %21 {strides = array<i32>} : memref<128x128xbf16, #tpu.memory_space<vmem>>, vector<128x128xbf16>,
    } else {
    }
    return
  }
  func.func @transform_0(%arg0: i32, %arg1: i32) -> (i32, i32) {
    %c0_i32 = arith.constant 0 : i32
    return %arg0, %arg1 : i32, i32
  }
  func.func @transform_1(%arg0: i32, %arg1: i32) -> (i32, i32) {
    %c0_i32 = arith.constant 0 : i32
    %c0_i32_0 = arith.constant 0 : i32
    %c0_i32_1 = arith.constant 0 : i32
    return %c0_i32, %c0_i32_0 : i32, i32
  }
  func.func @transform_2(%arg0: i32, %arg1: i32) -> (i32, i32) {
    %c0_i32 = arith.constant 0 : i32
    %c0_i32_0 = arith.constant 0 : i32
    %c0_i32_1 = arith.constant 0 : i32
    return %c0_i32, %c0_i32_0 : i32, i32
  }
  func.func @transform_3(%arg0: i32, %arg1: i32) -> (i32, i32) {
    %c0_i32 = arith.constant 0 : i32
    %c0_i32_0 = arith.constant 0 : i32
    return %arg0, %c0_i32 : i32, i32
  }
}

module attributes {stable_mosaic.version = 11 : i64} {
  func.func @_aggregate_kernel(%arg0: i32, %arg1: i32, %arg2: memref<128x128xbf16, #tpu.memory_space<vmem>>, %arg3: memref<128x128xbf16, #tpu.memory_space<vmem>>, %arg4: memref<1x128xf32, #tpu.memory_space<vmem>>, %arg5: memref<128x128xf32, #tpu.memory_space<vmem>>, %arg6: memref<128x128xf32, #tpu.memory_space<vmem>>) attributes {dimension_semantics = [#tpu.dimension_semantics<parallel>, #tpu.dimension_semantics<arbitrary>], iteration_bounds = array<i64: 1, 1>, scalar_prefetch = 0 : i64, scratch_operands = 1 : i64, tpu.core_type = #tpu.core_type<tc>, window_params = [{transform_indices = @transform_0, window_bounds = array<i64: 128, 128>}, {pipeline_mode = #tpu.pipeline_mode<synchronous>, transform_indices = @transform_1, window_bounds = array<i64: 128, 128>}, {pipeline_mode = #tpu.pipeline_mode<synchronous>, transform_indices = @transform_2, window_bounds = array<i64: 1, 128>}, {transform_indices = @transform_3, window_bounds = array<i64: 128, 128>}]} {
    %c0_i32 = arith.constant 0 : i32
    %0 = arith.cmpi eq, %arg1, %c0_i32 : i32
    %1 = arith.extui %0 : i1 to i32
    %c0_i32_0 = arith.constant 0 : i32
    %2 = arith.cmpi ne, %1, %c0_i32_0 : i32
    scf.if %2 {
      %cst_9 = arith.constant 0.000000e+00 : f32
      %15 = vector.broadcast %cst_9 : f32 to vector<128x128xf32>
      %c0_10 = arith.constant 0 : index
      %c0_11 = arith.constant 0 : index
      %16 = vector.load %arg6[%c0_10, %c0_11] : memref<128x128xf32, #tpu.memory_space<vmem>>, vector<128x128xf32>
      tpu.vector_store %arg6[%c0_10, %c0_11], %15 {strides = array<i32>} : memref<128x128xf32, #tpu.memory_space<vmem>>, vector<128x128xf32>,
    } else {
    }
    %c128_i32 = arith.constant 128 : i32
    %3 = arith.muli %arg1, %c128_i32 : i32
    %4 = tpu.assume_multiple %3, 128 : i32
    %5 = arith.index_cast %4 : i32 to index
    %c0 = arith.constant 0 : index
    %6 = vector.load %arg3[%5, %c0] : memref<128x128xbf16, #tpu.memory_space<vmem>>, vector<128x128xbf16>
    %c0_1 = arith.constant 0 : index
    %c0_2 = arith.constant 0 : index
    %7 = vector.load %arg6[%c0_1, %c0_2] : memref<128x128xf32, #tpu.memory_space<vmem>>, vector<128x128xf32>
    %c0_3 = arith.constant 0 : index
    %c0_4 = arith.constant 0 : index
    %8 = vector.load %arg2[%c0_3, %c0_4] : memref<128x128xbf16, #tpu.memory_space<vmem>>, vector<128x128xbf16>
    %cst = arith.constant dense<0.000000e+00> : vector<128x128xf32>
    %9 = tpu.matmul %8, %6, %cst {dimension_numbers = #tpu.dot_dimension_numbers<[1], [0], [0], [1], [0, 0, 1, 1], [], []>} : vector<128x128xbf16>, vector<128x128xbf16>, vector<128x128xf32> -> vector<128x128xf32>
    %10 = arith.addf %7, %9 : vector<128x128xf32>
    %c0_5 = arith.constant 0 : index
    %c0_6 = arith.constant 0 : index
    %11 = vector.load %arg6[%c0_5, %c0_6] : memref<128x128xf32, #tpu.memory_space<vmem>>, vector<128x128xf32>
    tpu.vector_store %arg6[%c0_5, %c0_6], %10 {strides = array<i32>} : memref<128x128xf32, #tpu.memory_space<vmem>>, vector<128x128xf32>,
    %c0_i32_7 = arith.constant 0 : i32
    %12 = arith.cmpi eq, %arg1, %c0_i32_7 : i32
    %13 = arith.extui %12 : i1 to i32
    %c0_i32_8 = arith.constant 0 : i32
    %14 = arith.cmpi ne, %13, %c0_i32_8 : i32
    scf.if %14 {
      %c0_9 = arith.constant 0 : index
      %c0_10 = arith.constant 0 : index
      %15 = vector.load %arg6[%c0_9, %c0_10] : memref<128x128xf32, #tpu.memory_space<vmem>>, vector<128x128xf32>
      %c0_11 = arith.constant 0 : index
      %c0_12 = arith.constant 0 : index
      %16 = vector.load %arg4[%c0_11, %c0_12] : memref<1x128xf32, #tpu.memory_space<vmem>>, vector<1x128xf32>
      %17 = vector.broadcast %16 : vector<1x128xf32> to vector<128x128xf32>
      %18 = arith.addf %15, %17 : vector<128x128xf32>
      %c0_13 = arith.constant 0 : index
      %c0_14 = arith.constant 0 : index
      %19 = vector.load %arg5[%c0_13, %c0_14] : memref<128x128xf32, #tpu.memory_space<vmem>>, vector<128x128xf32>
      tpu.vector_store %arg5[%c0_13, %c0_14], %18 {strides = array<i32>} : memref<128x128xf32, #tpu.memory_space<vmem>>, vector<128x128xf32>,
    } else {
    }
    return
  }
  func.func @transform_0(%arg0: i32, %arg1: i32) -> (i32, i32) {
    %c0_i32 = arith.constant 0 : i32
    return %arg0, %arg1 : i32, i32
  }
  func.func @transform_1(%arg0: i32, %arg1: i32) -> (i32, i32) {
    %c0_i32 = arith.constant 0 : i32
    %c0_i32_0 = arith.constant 0 : i32
    %c0_i32_1 = arith.constant 0 : i32
    return %c0_i32, %c0_i32_0 : i32, i32
  }
  func.func @transform_2(%arg0: i32, %arg1: i32) -> (i32, i32) {
    %c0_i32 = arith.constant 0 : i32
    %c0_i32_0 = arith.constant 0 : i32
    %c0_i32_1 = arith.constant 0 : i32
    return %c0_i32, %c0_i32_0 : i32, i32
  }
  func.func @transform_3(%arg0: i32, %arg1: i32) -> (i32, i32) {
    %c0_i32 = arith.constant 0 : i32
    %c0_i32_0 = arith.constant 0 : i32
    return %arg0, %c0_i32 : i32, i32
  }
}

</mosaic_0001>

<bundles_post_ra>
// kernel: model_forward.4
= control target key start
LH: loop header
LB: loop body
LE: loop exit
PB: predicated region body
PF: predicated region fallthrough
CT: control target
= control target key end

     0   :  { %s462_s1 = inlined_call_operand.vmem [shape: bf16[128,128], index: 1, kind: input, shape index: {}]   ;;  %s463_s0 = inlined_call_operand.vmem [shape: bf16[128,128], index: 0, kind: input, shape index: {}]   ;;  %s464_s2 = inlined_call_operand.vmem [shape: bf16[128,128], index: 2, kind: output, shape index: {}]  }
   0x1   :  { %v303_v0 = vld [vmem:[%s462_s1 + $0x38] sm:$0xff]  ;;  %v302_v1 = vld [vmem:[%s462_s1 + $0x30] sm:$0xff]  ;;  %v301_v2 = vld [vmem:[%s462_s1 + $0x28] sm:$0xff] }
   0x2   :  { %139 = vmatpush.bf16.msra.mxu0 %v303_v0  ;;  %351 = vmatpush.bf16.msra.mxu1 %v303_v0  ;;  %v300_v3 = vld [vmem:[%s462_s1 + $0x20] sm:$0xff]  ;;  %v299_v4 = vld [vmem:[%s462_s1 + $0x18] sm:$0xff]  ;;  %v298_v5 = vld [vmem:[%s462_s1 + $0x10] sm:$0xff] }
   0x3   :  { %352 = vmatpush.bf16.msra.mxu2 %v303_v0  ;;  %353 = vmatpush.bf16.msra.mxu3 %v303_v0  ;;  %v297_v6 = vld [vmem:[%s462_s1 + $0x8] sm:$0xff]  ;;  %v296_v7 = vld [vmem:[%s462_s1] sm:$0xff]  ;;  %v290_v9 = vld [vmem:[%s463_s0 + $0x10] sm:$0xff] }
   0x4   :  { %v288_v8 = vld [vmem:[%s463_s0] sm:$0xff]  ;;  %v294_v11 = vld [vmem:[%s463_s0 + $0x30] sm:$0xff]  ;;  %v289_v12 = vld [vmem:[%s463_s0 + $0x8] sm:$0xff] }
   0x5   :  { %v292_v10 = vld [vmem:[%s463_s0 + $0x20] sm:$0xff]  ;;  %v291_v13 = vld [vmem:[%s463_s0 + $0x18] sm:$0xff]  ;;  %v293_v14 = vld [vmem:[%s463_s0 + $0x28] sm:$0xff] }
   0x6   :  { %140 = vmatpush.bf16.msra.mxu0 %v302_v1  ;;  %354 = vmatpush.bf16.msra.mxu1 %v302_v1  ;;  %v295_v15 = vld [vmem:[%s463_s0 + $0x38] sm:$0xff] }
   0x7   :  { %355 = vmatpush.bf16.msra.mxu2 %v302_v1  ;;  %356 = vmatpush.bf16.msra.mxu3 %v302_v1 }
   0xa   :  { %141 = vmatpush.bf16.msra.mxu0 %v301_v2  ;;  %357 = vmatpush.bf16.msra.mxu1 %v301_v2 }
   0xb   :  { %358 = vmatpush.bf16.msra.mxu2 %v301_v2  ;;  %359 = vmatpush.bf16.msra.mxu3 %v301_v2 }
   0xe   :  { %142 = vmatpush.bf16.msra.mxu0 %v300_v3  ;;  %360 = vmatpush.bf16.msra.mxu1 %v300_v3 }
   0xf   :  { %361 = vmatpush.bf16.msra.mxu2 %v300_v3  ;;  %362 = vmatpush.bf16.msra.mxu3 %v300_v3 }
  0x12   :  { %143 = vmatpush.bf16.msra.mxu0 %v299_v4  ;;  %363 = vmatpush.bf16.msra.mxu1 %v299_v4 }
  0x13   :  { %364 = vmatpush.bf16.msra.mxu2 %v299_v4  ;;  %365 = vmatpush.bf16.msra.mxu3 %v299_v4 }
  0x16   :  { %144 = vmatpush.bf16.msra.mxu0 %v298_v5  ;;  %366 = vmatpush.bf16.msra.mxu1 %v298_v5 }
  0x17   :  { %367 = vmatpush.bf16.msra.mxu2 %v298_v5  ;;  %368 = vmatpush.bf16.msra.mxu3 %v298_v5 }
  0x1a   :  { %145 = vmatpush.bf16.msra.mxu0 %v297_v6  ;;  %369 = vmatpush.bf16.msra.mxu1 %v297_v6 }
  0x1b   :  { %370 = vmatpush.bf16.msra.mxu2 %v297_v6  ;;  %371 = vmatpush.bf16.msra.mxu3 %v297_v6 }
  0x1e   :  { %146 = vmatpush.bf16.msra.mxu0 %v296_v7  ;;  %372 = vmatpush.bf16.msra.mxu1 %v296_v7 }
  0x1f   :  { %373 = vmatpush.bf16.msra.mxu2 %v296_v7  ;;  %374 = vmatpush.bf16.msra.mxu3 %v296_v7 }
  0x21   :  { %147 = vmatmul.bf16.vlgmr.msra.gmra.mxu0 %v288_v8  ;;  %157 = vmatmul.bf16.vlgmr.msra.gmra.mxu1 %v290_v9 }
  0x22   :  { %167 = vmatmul.bf16.vlgmr.msra.gmra.mxu2 %v292_v10  ;;  %177 = vmatmul.bf16.vlgmr.msra.gmra.mxu3 %v294_v11 }
  0x31   :  { %152 = vmatmul.bf16.gmra.mxu0 %v289_v12  ;;  %162 = vmatmul.bf16.gmra.mxu1 %v291_v13 }
  0x32   :  { %172 = vmatmul.bf16.gmra.mxu2 %v293_v14  ;;  %182 = vmatmul.bf16.gmra.mxu3 %v295_v15 }
  0x9e   :  { %v148_v16 = vpop.f32.mrf.mxu0  ;;  %v158_v17 = vpop.f32.mrf.mxu1 }
  0xa5   :  { %v168_v18 = vpop.f32.mrf.mxu2  ;;  %v178_v19 = vpop.f32.mrf.mxu3 }
  0xa6   :  { %v150_v20 = vpop.f32.mrf.mxu0  ;;  %v160_v21 = vpop.f32.mrf.mxu1 }
  0xa7   :  { %v307_v22 = vpack.c.bf16 %v150_v20, %v148_v16  ;;  %v317_v23 = vpack.c.bf16 %v160_v21, %v158_v17 }
  0xa9   :  { %308 = vst [vmem:[%s464_s2] sm:$0xff] %v307_v22  }
  0xaa   :  { %345 = vst [vmem:[%s464_s2 + $0x10] sm:$0xff] %v317_v23  }
  0xad   :  { %v170_v24 = vpop.f32.mrf.mxu2  ;;  %v180_v25 = vpop.f32.mrf.mxu3 }
  0xae   :  { %v327_v26 = vpack.c.bf16 %v170_v24, %v168_v18  ;;  %v337_v27 = vpack.c.bf16 %v180_v25, %v178_v19  ;;  %v153_v28 = vpop.f32.mrf.mxu0  ;;  %v163_v29 = vpop.f32.mrf.mxu1 }
  0xb0   :  { %347 = vst [vmem:[%s464_s2 + $0x20] sm:$0xff] %v327_v26  }
  0xb1   :  { %349 = vst [vmem:[%s464_s2 + $0x30] sm:$0xff] %v337_v27  }
  0xb5   :  { %v173_v30 = vpop.f32.mrf.mxu2  ;;  %v183_v31 = vpop.f32.mrf.mxu3 }
  0xb6   :  { %v155_v32 = vpop.f32.mrf.mxu0  ;;  %v165_v33 = vpop.f32.mrf.mxu1 }
  0xb7   :  { %v312_v34 = vpack.c.bf16 %v155_v32, %v153_v28  ;;  %v322_v35 = vpack.c.bf16 %v165_v33, %v163_v29 }
  0xb9   :  { %344 = vst [vmem:[%s464_s2 + $0x8] sm:$0xff] %v312_v34  }
  0xba   :  { %346 = vst [vmem:[%s464_s2 + $0x18] sm:$0xff] %v322_v35  }
  0xbd   :  { %v175_v36 = vpop.f32.mrf.mxu2  ;;  %v185_v37 = vpop.f32.mrf.mxu3 }
  0xbe   :  { %v332_v38 = vpack.c.bf16 %v175_v36, %v173_v30  ;;  %v342_v39 = vpack.c.bf16 %v185_v37, %v183_v31 }
  0xc0   :  { %348 = vst [vmem:[%s464_s2 + $0x28] sm:$0xff] %v332_v38  }
  0xc1   :  { %350 = vst [vmem:[%s464_s2 + $0x38] sm:$0xff] %v342_v39  }

// kernel: model_forward.5
= control target key start
LH: loop header
LB: loop body
LE: loop exit
PB: predicated region body
PF: predicated region fallthrough
CT: control target
= control target key end

     0   :  { %s604_s1 = inlined_call_operand.vmem [shape: bf16[128,128], index: 1, kind: input, shape index: {}]   ;;  %s605_s2 = inlined_call_operand.vmem [shape: f32[1,128], index: 2, kind: input, shape index: {}]   ;;  %s606_s0 = inlined_call_operand.vmem [shape: bf16[128,128], index: 0, kind: input, shape index: {}]   ;;  %s607_s3 = inlined_call_operand.vmem [shape: bf16[128,128], index: 3, kind: output, shape index: {}]  }
   0x1   :  { %v428_v0 = vld [vmem:[%s604_s1 + $0x38] sm:$0xff]  ;;  %v427_v1 = vld [vmem:[%s604_s1 + $0x30] sm:$0xff]  ;;  %v426_v2 = vld [vmem:[%s604_s1 + $0x28] sm:$0xff] }
   0x2   :  { %183 = vmatpush.bf16.msra.mxu0 %v428_v0  ;;  %484 = vmatpush.bf16.msra.mxu1 %v428_v0  ;;  %v425_v3 = vld [vmem:[%s604_s1 + $0x20] sm:$0xff]  ;;  %v424_v4 = vld [vmem:[%s604_s1 + $0x18] sm:$0xff]  ;;  %v423_v5 = vld [vmem:[%s604_s1 + $0x10] sm:$0xff] }
   0x3   :  { %485 = vmatpush.bf16.msra.mxu2 %v428_v0  ;;  %486 = vmatpush.bf16.msra.mxu3 %v428_v0  ;;  %v422_v6 = vld [vmem:[%s604_s1 + $0x8] sm:$0xff]  ;;  %v421_v7 = vld [vmem:[%s604_s1] sm:$0xff]  ;;  %v431_v9 = vld [vmem:[%s606_s0 + $0x10] sm:$0xff] }
   0x4   :  { %v429_v8 = vld [vmem:[%s606_s0] sm:$0xff]  ;;  %v435_v11 = vld [vmem:[%s606_s0 + $0x30] sm:$0xff]  ;;  %v430_v12 = vld [vmem:[%s606_s0 + $0x8] sm:$0xff] }
   0x5   :  { %v433_v10 = vld [vmem:[%s606_s0 + $0x20] sm:$0xff]  ;;  %v432_v13 = vld [vmem:[%s606_s0 + $0x18] sm:$0xff]  ;;  %v434_v14 = vld [vmem:[%s606_s0 + $0x28] sm:$0xff] }
   0x6   :  { %184 = vmatpush.bf16.msra.mxu0 %v427_v1  ;;  %487 = vmatpush.bf16.msra.mxu1 %v427_v1  ;;  %v436_v15 = vld [vmem:[%s606_s0 + $0x38] sm:$0xff]  ;;  %v508_v18 = vld [vmem:[%s605_s2] ss:$0 sm:$0xff] }
   0x7   :  { %488 = vmatpush.bf16.msra.mxu2 %v427_v1  ;;  %489 = vmatpush.bf16.msra.mxu3 %v427_v1 }
   0xa   :  { %185 = vmatpush.bf16.msra.mxu0 %v426_v2  ;;  %490 = vmatpush.bf16.msra.mxu1 %v426_v2 }
   0xb   :  { %491 = vmatpush.bf16.msra.mxu2 %v426_v2  ;;  %492 = vmatpush.bf16.msra.mxu3 %v426_v2 }
   0xe   :  { %186 = vmatpush.bf16.msra.mxu0 %v425_v3  ;;  %493 = vmatpush.bf16.msra.mxu1 %v425_v3 }
   0xf   :  { %494 = vmatpush.bf16.msra.mxu2 %v425_v3  ;;  %495 = vmatpush.bf16.msra.mxu3 %v425_v3 }
  0x12   :  { %187 = vmatpush.bf16.msra.mxu0 %v424_v4  ;;  %496 = vmatpush.bf16.msra.mxu1 %v424_v4 }
  0x13   :  { %497 = vmatpush.bf16.msra.mxu2 %v424_v4  ;;  %498 = vmatpush.bf16.msra.mxu3 %v424_v4 }
  0x16   :  { %188 = vmatpush.bf16.msra.mxu0 %v423_v5  ;;  %499 = vmatpush.bf16.msra.mxu1 %v423_v5 }
  0x17   :  { %500 = vmatpush.bf16.msra.mxu2 %v423_v5  ;;  %501 = vmatpush.bf16.msra.mxu3 %v423_v5 }
  0x1a   :  { %189 = vmatpush.bf16.msra.mxu0 %v422_v6  ;;  %502 = vmatpush.bf16.msra.mxu1 %v422_v6 }
  0x1b   :  { %503 = vmatpush.bf16.msra.mxu2 %v422_v6  ;;  %504 = vmatpush.bf16.msra.mxu3 %v422_v6 }
  0x1e   :  { %190 = vmatpush.bf16.msra.mxu0 %v421_v7  ;;  %505 = vmatpush.bf16.msra.mxu1 %v421_v7 }
  0x1f   :  { %506 = vmatpush.bf16.msra.mxu2 %v421_v7  ;;  %507 = vmatpush.bf16.msra.mxu3 %v421_v7 }
  0x21   :  { %191 = vmatmul.bf16.vlgmr.msra.gmra.mxu0 %v429_v8  ;;  %201 = vmatmul.bf16.vlgmr.msra.gmra.mxu1 %v431_v9 }
  0x22   :  { %211 = vmatmul.bf16.vlgmr.msra.gmra.mxu2 %v433_v10  ;;  %221 = vmatmul.bf16.vlgmr.msra.gmra.mxu3 %v435_v11 }
  0x31   :  { %196 = vmatmul.bf16.gmra.mxu0 %v430_v12  ;;  %206 = vmatmul.bf16.gmra.mxu1 %v432_v13 }
  0x32   :  { %216 = vmatmul.bf16.gmra.mxu2 %v434_v14  ;;  %226 = vmatmul.bf16.gmra.mxu3 %v436_v15 }
  0x9e   :  { %v192_v16 = vpop.f32.mrf.mxu0  ;;  %v202_v17 = vpop.f32.mrf.mxu1 }
  0x9f   :  { %v287_v19 = vadd.f32 %v508_v18, %v192_v16  ;;  %v291_v20 = vadd.f32 %v508_v18, %v202_v17 }
  0xa1   :  { %v303_v27 = vmax.f32 %v287_v19, 0.0  ;;  %v307_v28 = vmax.f32 %v291_v20, 0.0 }
  0xa5   :  { %v212_v21 = vpop.f32.mrf.mxu2  ;;  %v222_v22 = vpop.f32.mrf.mxu3 }
  0xa6   :  { %v194_v23 = vpop.f32.mrf.mxu0  ;;  %v204_v24 = vpop.f32.mrf.mxu1  ;;  %v295_v33 = vadd.f32 %v508_v18, %v212_v21  ;;  %v299_v34 = vadd.f32 %v508_v18, %v222_v22 }
  0xa7   :  { %v288_v25 = vadd.f32 %v508_v18, %v194_v23  ;;  %v292_v26 = vadd.f32 %v508_v18, %v204_v24 }
  0xa8   :  { %v311_v41 = vmax.f32 %v295_v33, 0.0  ;;  %v315_v42 = vmax.f32 %v299_v34, 0.0 }
  0xa9   :  { %v304_v29 = vmax.f32 %v288_v25, 0.0  ;;  %v308_v30 = vmax.f32 %v292_v26, 0.0 }
  0xab   :  { %v440_v31 = vpack.c.bf16 %v304_v29, %v303_v27  ;;  %v450_v32 = vpack.c.bf16 %v308_v30, %v307_v28 }
  0xad   :  { %441 = vst [vmem:[%s607_s3] sm:$0xff] %v440_v31   ;;  %v214_v35 = vpop.f32.mrf.mxu2  ;;  %v224_v36 = vpop.f32.mrf.mxu3 }
  0xae   :  { %478 = vst [vmem:[%s607_s3 + $0x10] sm:$0xff] %v450_v32   ;;  %v296_v37 = vadd.f32 %v508_v18, %v214_v35  ;;  %v300_v38 = vadd.f32 %v508_v18, %v224_v36  ;;  %v197_v39 = vpop.f32.mrf.mxu0  ;;  %v207_v40 = vpop.f32.mrf.mxu1 }
  0xaf   :  { %v289_v47 = vadd.f32 %v508_v18, %v197_v39  ;;  %v293_v48 = vadd.f32 %v508_v18, %v207_v40 }
  0xb0   :  { %v312_v43 = vmax.f32 %v296_v37, 0.0  ;;  %v316_v44 = vmax.f32 %v300_v38, 0.0 }
  0xb1   :  { %v305_v55 = vmax.f32 %v289_v47, 0.0  ;;  %v309_v56 = vmax.f32 %v293_v48, 0.0 }
  0xb2   :  { %v460_v45 = vpack.c.bf16 %v312_v43, %v311_v41  ;;  %v470_v46 = vpack.c.bf16 %v316_v44, %v315_v42 }
  0xb4   :  { %480 = vst [vmem:[%s607_s3 + $0x20] sm:$0xff] %v460_v45  }
  0xb5   :  { %482 = vst [vmem:[%s607_s3 + $0x30] sm:$0xff] %v470_v46   ;;  %v217_v49 = vpop.f32.mrf.mxu2  ;;  %v227_v50 = vpop.f32.mrf.mxu3 }
  0xb6   :  { %v199_v51 = vpop.f32.mrf.mxu0  ;;  %v209_v52 = vpop.f32.mrf.mxu1  ;;  %v297_v61 = vadd.f32 %v508_v18, %v217_v49  ;;  %v301_v62 = vadd.f32 %v508_v18, %v227_v50 }
  0xb7   :  { %v290_v53 = vadd.f32 %v508_v18, %v199_v51  ;;  %v294_v54 = vadd.f32 %v508_v18, %v209_v52 }
  0xb8   :  { %v313_v3 = vmax.f32 %v297_v61, 0.0  ;;  %v317_v4 = vmax.f32 %v301_v62, 0.0 }
  0xb9   :  { %v306_v57 = vmax.f32 %v290_v53, 0.0  ;;  %v310_v58 = vmax.f32 %v294_v54, 0.0 }
  0xbb   :  { %v445_v59 = vpack.c.bf16 %v306_v57, %v305_v55  ;;  %v455_v60 = vpack.c.bf16 %v310_v58, %v309_v56 }
  0xbd   :  { %477 = vst [vmem:[%s607_s3 + $0x8] sm:$0xff] %v445_v59   ;;  %v219_v63 = vpop.f32.mrf.mxu2  ;;  %v229_v0 = vpop.f32.mrf.mxu3 }
  0xbe   :  { %479 = vst [vmem:[%s607_s3 + $0x18] sm:$0xff] %v455_v60   ;;  %v298_v1 = vadd.f32 %v508_v18, %v219_v63  ;;  %v302_v2 = vadd.f32 %v508_v18, %v229_v0 }
  0xc0   :  { %v314_v5 = vmax.f32 %v298_v1, 0.0  ;;  %v318_v6 = vmax.f32 %v302_v2, 0.0 }
  0xc2   :  { %v465_v7 = vpack.c.bf16 %v314_v5, %v313_v3  ;;  %v475_v8 = vpack.c.bf16 %v318_v6, %v317_v4 }
  0xc4   :  { %481 = vst [vmem:[%s607_s3 + $0x28] sm:$0xff] %v465_v7  }
  0xc5   :  { %483 = vst [vmem:[%s607_s3 + $0x38] sm:$0xff] %v475_v8  }

// kernel: model_forward.7
= control target key start
LH: loop header
LB: loop body
LE: loop exit
PB: predicated region body
PF: predicated region fallthrough
CT: control target
= control target key end

     0   :  { %s549_s1 = inlined_call_operand.vmem [shape: bf16[128,128], index: 1, kind: input, shape index: {}]   ;;  %s550_s2 = inlined_call_operand.vmem [shape: f32[1,128], index: 2, kind: input, shape index: {}]   ;;  %s551_s0 = inlined_call_operand.vmem [shape: bf16[128,128], index: 0, kind: input, shape index: {}]   ;;  %s552_s3 = inlined_call_operand.vmem [shape: f32[128,128], index: 3, kind: output, shape index: {}]  }
   0x1   :  { %v396_v0 = vld [vmem:[%s549_s1 + $0x38] sm:$0xff]  ;;  %v395_v1 = vld [vmem:[%s549_s1 + $0x30] sm:$0xff]  ;;  %v394_v2 = vld [vmem:[%s549_s1 + $0x28] sm:$0xff] }
   0x2   :  { %183 = vmatpush.bf16.msra.mxu0 %v396_v0  ;;  %405 = vmatpush.bf16.msra.mxu1 %v396_v0  ;;  %v393_v3 = vld [vmem:[%s549_s1 + $0x20] sm:$0xff]  ;;  %v392_v4 = vld [vmem:[%s549_s1 + $0x18] sm:$0xff]  ;;  %v391_v5 = vld [vmem:[%s549_s1 + $0x10] sm:$0xff] }
   0x3   :  { %406 = vmatpush.bf16.msra.mxu2 %v396_v0  ;;  %407 = vmatpush.bf16.msra.mxu3 %v396_v0  ;;  %v390_v6 = vld [vmem:[%s549_s1 + $0x8] sm:$0xff]  ;;  %v389_v7 = vld [vmem:[%s549_s1] sm:$0xff]  ;;  %v399_v9 = vld [vmem:[%s551_s0 + $0x10] sm:$0xff] }
   0x4   :  { %v397_v8 = vld [vmem:[%s551_s0] sm:$0xff]  ;;  %v403_v11 = vld [vmem:[%s551_s0 + $0x30] sm:$0xff]  ;;  %v398_v12 = vld [vmem:[%s551_s0 + $0x8] sm:$0xff] }
   0x5   :  { %v401_v10 = vld [vmem:[%s551_s0 + $0x20] sm:$0xff]  ;;  %v400_v13 = vld [vmem:[%s551_s0 + $0x18] sm:$0xff]  ;;  %v402_v14 = vld [vmem:[%s551_s0 + $0x28] sm:$0xff] }
   0x6   :  { %184 = vmatpush.bf16.msra.mxu0 %v395_v1  ;;  %408 = vmatpush.bf16.msra.mxu1 %v395_v1  ;;  %v404_v15 = vld [vmem:[%s551_s0 + $0x38] sm:$0xff]  ;;  %v429_v16 = vld [vmem:[%s550_s2] ss:$0 sm:$0xff] }
   0x7   :  { %409 = vmatpush.bf16.msra.mxu2 %v395_v1  ;;  %410 = vmatpush.bf16.msra.mxu3 %v395_v1 }
   0xa   :  { %185 = vmatpush.bf16.msra.mxu0 %v394_v2  ;;  %411 = vmatpush.bf16.msra.mxu1 %v394_v2 }
   0xb   :  { %412 = vmatpush.bf16.msra.mxu2 %v394_v2  ;;  %413 = vmatpush.bf16.msra.mxu3 %v394_v2 }
   0xe   :  { %186 = vmatpush.bf16.msra.mxu0 %v393_v3  ;;  %414 = vmatpush.bf16.msra.mxu1 %v393_v3 }
   0xf   :  { %415 = vmatpush.bf16.msra.mxu2 %v393_v3  ;;  %416 = vmatpush.bf16.msra.mxu3 %v393_v3 }
  0x12   :  { %187 = vmatpush.bf16.msra.mxu0 %v392_v4  ;;  %417 = vmatpush.bf16.msra.mxu1 %v392_v4 }
  0x13   :  { %418 = vmatpush.bf16.msra.mxu2 %v392_v4  ;;  %419 = vmatpush.bf16.msra.mxu3 %v392_v4 }
  0x16   :  { %188 = vmatpush.bf16.msra.mxu0 %v391_v5  ;;  %420 = vmatpush.bf16.msra.mxu1 %v391_v5 }
  0x17   :  { %421 = vmatpush.bf16.msra.mxu2 %v391_v5  ;;  %422 = vmatpush.bf16.msra.mxu3 %v391_v5 }
  0x1a   :  { %189 = vmatpush.bf16.msra.mxu0 %v390_v6  ;;  %423 = vmatpush.bf16.msra.mxu1 %v390_v6 }
  0x1b   :  { %424 = vmatpush.bf16.msra.mxu2 %v390_v6  ;;  %425 = vmatpush.bf16.msra.mxu3 %v390_v6 }
  0x1e   :  { %190 = vmatpush.bf16.msra.mxu0 %v389_v7  ;;  %426 = vmatpush.bf16.msra.mxu1 %v389_v7 }
  0x1f   :  { %427 = vmatpush.bf16.msra.mxu2 %v389_v7  ;;  %428 = vmatpush.bf16.msra.mxu3 %v389_v7 }
  0x21   :  { %191 = vmatmul.bf16.vlgmr.msra.gmra.mxu0 %v397_v8  ;;  %201 = vmatmul.bf16.vlgmr.msra.gmra.mxu1 %v399_v9 }
  0x22   :  { %211 = vmatmul.bf16.vlgmr.msra.gmra.mxu2 %v401_v10  ;;  %221 = vmatmul.bf16.vlgmr.msra.gmra.mxu3 %v403_v11 }
  0x31   :  { %196 = vmatmul.bf16.gmra.mxu0 %v398_v12  ;;  %206 = vmatmul.bf16.gmra.mxu1 %v400_v13 }
  0x32   :  { %216 = vmatmul.bf16.gmra.mxu2 %v402_v14  ;;  %226 = vmatmul.bf16.gmra.mxu3 %v404_v15 }
  0x9e   :  { %v192_v17 = vpop.f32.mrf.mxu0  ;;  %v202_v18 = vpop.f32.mrf.mxu1 }
  0x9f   :  { %v287_v19 = vadd.f32 %v429_v16, %v192_v17  ;;  %v291_v20 = vadd.f32 %v429_v16, %v202_v18 }
  0xa1   :  { %303 = vst [vmem:[%s552_s3] sm:$0xff] %v287_v19 }
  0xa2   :  { %307 = vst [vmem:[%s552_s3 + $0x20] sm:$0xff] %v291_v20 }
  0xa5   :  { %v212_v21 = vpop.f32.mrf.mxu2  ;;  %v222_v22 = vpop.f32.mrf.mxu3 }
  0xa6   :  { %v295_v23 = vadd.f32 %v429_v16, %v212_v21  ;;  %v299_v24 = vadd.f32 %v429_v16, %v222_v22  ;;  %v194_v25 = vpop.f32.mrf.mxu0  ;;  %v204_v26 = vpop.f32.mrf.mxu1 }
  0xa7   :  { %v288_v27 = vadd.f32 %v429_v16, %v194_v25  ;;  %v292_v28 = vadd.f32 %v429_v16, %v204_v26 }
  0xa8   :  { %311 = vst [vmem:[%s552_s3 + $0x40] sm:$0xff] %v295_v23 }
  0xa9   :  { %315 = vst [vmem:[%s552_s3 + $0x60] sm:$0xff] %v299_v24 }
  0xaa   :  { %304 = vst [vmem:[%s552_s3 + $0x8] sm:$0xff] %v288_v27 }
  0xab   :  { %308 = vst [vmem:[%s552_s3 + $0x28] sm:$0xff] %v292_v28 }
  0xad   :  { %v214_v29 = vpop.f32.mrf.mxu2  ;;  %v224_v30 = vpop.f32.mrf.mxu3 }
  0xae   :  { %v296_v31 = vadd.f32 %v429_v16, %v214_v29  ;;  %v300_v32 = vadd.f32 %v429_v16, %v224_v30  ;;  %v197_v33 = vpop.f32.mrf.mxu0  ;;  %v207_v34 = vpop.f32.mrf.mxu1 }
  0xaf   :  { %v289_v35 = vadd.f32 %v429_v16, %v197_v33  ;;  %v293_v36 = vadd.f32 %v429_v16, %v207_v34 }
  0xb0   :  { %312 = vst [vmem:[%s552_s3 + $0x48] sm:$0xff] %v296_v31 }
  0xb1   :  { %316 = vst [vmem:[%s552_s3 + $0x68] sm:$0xff] %v300_v32 }
  0xb2   :  { %305 = vst [vmem:[%s552_s3 + $0x10] sm:$0xff] %v289_v35 }
  0xb3   :  { %309 = vst [vmem:[%s552_s3 + $0x30] sm:$0xff] %v293_v36 }
  0xb5   :  { %v217_v37 = vpop.f32.mrf.mxu2  ;;  %v227_v38 = vpop.f32.mrf.mxu3 }
  0xb6   :  { %v297_v39 = vadd.f32 %v429_v16, %v217_v37  ;;  %v301_v40 = vadd.f32 %v429_v16, %v227_v38  ;;  %v199_v41 = vpop.f32.mrf.mxu0  ;;  %v209_v42 = vpop.f32.mrf.mxu1 }
  0xb7   :  { %v290_v43 = vadd.f32 %v429_v16, %v199_v41  ;;  %v294_v44 = vadd.f32 %v429_v16, %v209_v42 }
  0xb8   :  { %313 = vst [vmem:[%s552_s3 + $0x50] sm:$0xff] %v297_v39 }
  0xb9   :  { %317 = vst [vmem:[%s552_s3 + $0x70] sm:$0xff] %v301_v40 }
  0xba   :  { %306 = vst [vmem:[%s552_s3 + $0x18] sm:$0xff] %v290_v43 }
  0xbb   :  { %310 = vst [vmem:[%s552_s3 + $0x38] sm:$0xff] %v294_v44 }
  0xbd   :  { %v219_v45 = vpop.f32.mrf.mxu2  ;;  %v229_v46 = vpop.f32.mrf.mxu3 }
  0xbe   :  { %v298_v47 = vadd.f32 %v429_v16, %v219_v45  ;;  %v302_v48 = vadd.f32 %v429_v16, %v229_v46 }
  0xc0   :  { %314 = vst [vmem:[%s552_s3 + $0x58] sm:$0xff] %v298_v47 }
  0xc1   :  { %318 = vst [vmem:[%s552_s3 + $0x78] sm:$0xff] %v302_v48 }

</bundles_post_ra>
